<compile_context>
chip_gen: v7x
topology: tpu7x:2x2x1
jax: 0.10.0
libtpu: 0.0.40
codegen_flags: <defaults>
</compile_context>

<pallas_src>
import functools

import jax
import jax.numpy as jnp
from jax.experimental import pallas as pl
from jax.experimental.pallas import tpu as pltpu


def _ntxent_kernel(q_ref, p_ref, k_ref, out_ref,
                   q_scr, m_scr, s_scr, pos_scr,
                   *, inv_t, tq, tk, compute_dtype):
    qi = pl.program_id(0)
    ki = pl.program_id(1)
    nk = pl.num_programs(1)

    NEG = jnp.float32(-1e30)
    EPS = jnp.float32(1e-16)          # rsqrt(max(sumsq,1e-16)) == 1/max(||x||,1e-8)

    # --- column block: normalize rows in f32, cast to matmul dtype ----------
    k = k_ref[...].astype(jnp.float32)
    k_rs = jax.lax.rsqrt(jnp.maximum(jnp.sum(k * k, axis=-1, keepdims=True), EPS))
    k_n = (k * k_rs).astype(compute_dtype)

    # --- first column step: init accumulators, cache the scaled row block ---
    @pl.when(ki == 0)
    def _():
        q = q_ref[...].astype(jnp.float32)
        q_rs = jax.lax.rsqrt(jnp.maximum(jnp.sum(q * q, axis=-1, keepdims=True), EPS))
        q_n = q * q_rs * jnp.float32(inv_t)          # fold 1/T into the LHS
        q_scr[...] = q_n.astype(compute_dtype)

        # positives: row-wise dot with the paired (swapped-half) row block
        p = p_ref[...].astype(jnp.float32)
        p_rs = jax.lax.rsqrt(jnp.maximum(jnp.sum(p * p, axis=-1, keepdims=True), EPS))
        pos_scr[...] = jnp.sum(q_n * (p * p_rs), axis=-1, keepdims=True)

        m_scr[...] = jnp.full(m_scr.shape, NEG, dtype=jnp.float32)
        s_scr[...] = jnp.zeros(s_scr.shape, dtype=jnp.float32)

    # --- logits block: [tq, tk], contraction on last axes (no transpose) ----
    logits = jax.lax.dot_general(
        q_scr[...], k_n,
        dimension_numbers=(((1,), (1,)), ((), ())),
        preferred_element_type=jnp.float32,
    )

    def online_update(blk):
        m_prev = m_scr[...]
        m_new = jnp.maximum(m_prev, jnp.max(blk, axis=-1, keepdims=True))
        alpha = jnp.exp(m_prev - m_new)
        s_scr[...] = alpha * s_scr[...] + jnp.sum(jnp.exp(blk - m_new),
                                                  axis=-1, keepdims=True)
        m_scr[...] = m_new

    # Only tiles that intersect the j == i diagonal pay for the self-mask.
    row0 = qi * tq
    col0 = ki * tk
    touches_diag = jnp.logical_and(row0 < col0 + tk, col0 < row0 + tq)

    @pl.when(touches_diag)
    def _():
        row_g = row0 + jax.lax.broadcasted_iota(jnp.int32, (tq, tk), 0)
        col_g = col0 + jax.lax.broadcasted_iota(jnp.int32, (tq, tk), 1)
        online_update(jnp.where(row_g == col_g, NEG, logits))

    @pl.when(jnp.logical_not(touches_diag))
    def _():
        online_update(logits)

    # --- last column step: write per-row (lse - pos/T) -----------------------
    @pl.when(ki == nk - 1)
    def _():
        out_ref[...] = (m_scr[...] + jnp.log(s_scr[...])) - pos_scr[...]


def _pick_tile(n, cap):
    """Largest tile <= cap that divides n and is a multiple of 8 (or n itself)."""
    if n <= cap:
        return n
    if n % 8 != 0:
        return n  # fall back to full rows if n is not sublane-tileable
    t = (cap // 8) * 8
    while t >= 8:
        if n % t == 0:
            return t
        t -= 8
    return n


def _tile_caps(d, in_bytes, c_bytes, budget=24 * 1024 * 1024):
    """Shrink tile caps so the pipelined live set stays within `budget` VMEM."""
    tq_cap, tk_cap = 512, 512

    def est(tq, tk):
        return (2 * tq * d * in_bytes      # q block (double buffered)
                + 2 * tq * d * in_bytes    # pair block (double buffered)
                + 2 * tk * d * in_bytes    # k blocks (double buffered)
                + tq * d * c_bytes         # cached scaled q
                + 4 * tq * tk * 4)         # logits / exp / mask temporaries

    while est(tq_cap, tk_cap) > budget and tk_cap > 128:
        tk_cap //= 2
    while est(tq_cap, tk_cap) > budget and tq_cap > 64:
        tq_cap //= 2
    return tq_cap, tk_cap


def ntxent_loss(zis, zjs, temperature, *, tq=None, tk=None):
    """zis, zjs: [B, D]. Returns scalar float32 NT-Xent loss."""
    B, D = zis.shape
    assert zjs.shape == (B, D)
    N = 2 * B

    # representations = cat([zjs, zis], 0); pair rows are the swapped halves
    # (pair[i] is the positive partner of rep[i]).  Done once in HBM by XLA.
    rep = jnp.concatenate([zjs, zis], axis=0)
    pair = jnp.concatenate([zis, zjs], axis=0)

    compute_dtype = jnp.bfloat16 if rep.dtype == jnp.bfloat16 else jnp.float32
    in_bytes = jnp.dtype(rep.dtype).itemsize
    c_bytes = jnp.dtype(compute_dtype).itemsize

    if tq is None or tk is None:
        tq_cap, tk_cap = _tile_caps(D, in_bytes, c_bytes)
        tq = _pick_tile(N, tq_cap)
        tk = _pick_tile(N, tk_cap)
    assert N % tq == 0 and N % tk == 0

    grid = (N // tq, N // tk)
    kernel = functools.partial(
        _ntxent_kernel,
        inv_t=1.0 / float(temperature),
        tq=tq, tk=tk,
        compute_dtype=compute_dtype,
    )

    per_row = pl.pallas_call(
        kernel,
        out_shape=jax.ShapeDtypeStruct((N, 1), jnp.float32),
        grid=grid,
        in_specs=[
            pl.BlockSpec((tq, D), lambda qi, ki: (qi, 0)),   # row block
            pl.BlockSpec((tq, D), lambda qi, ki: (qi, 0)),   # paired row block
            pl.BlockSpec((tk, D), lambda qi, ki: (ki, 0)),   # column block
        ],
        out_specs=pl.BlockSpec((tq, 1), lambda qi, ki: (qi, 0)),
        scratch_shapes=[
            pltpu.VMEM((tq, D), compute_dtype),   # scaled, normalized q block
            pltpu.VMEM((tq, 1), jnp.float32),     # running max
            pltpu.VMEM((tq, 1), jnp.float32),     # running sum-exp
            pltpu.VMEM((tq, 1), jnp.float32),     # positives
        ],
        compiler_params=pltpu.CompilerParams(
            dimension_semantics=("parallel", "arbitrary"),
            vmem_limit_bytes=48 * 1024 * 1024,
        ),
    )(rep, pair, rep)

    # CrossEntropy(target=0, reduction='sum') / (2B)
    return jnp.sum(per_row) / jnp.float32(N)


def _reference_loss(zis, zjs, temperature):
    # Pure-JAX reference mirroring the PyTorch forward exactly.
    B, _ = zis.shape
    N = 2 * B
    rep = jnp.concatenate([zjs, zis], axis=0).astype(jnp.float32)
    norms = jnp.linalg.norm(rep, axis=-1, keepdims=True)
    sim = (rep @ rep.T) / jnp.maximum(norms @ norms.T, 1e-8)
    l_pos = jnp.diagonal(sim, offset=B)
    r_pos = jnp.diagonal(sim, offset=-B)
    positives = jnp.concatenate([l_pos, r_pos]).reshape(N, 1)
    mask = ~(
        jnp.eye(N, dtype=bool)
        | jnp.eye(N, k=B, dtype=bool)
        | jnp.eye(N, k=-B, dtype=bool)
    )
    negatives = sim[mask].reshape(N, N - 2)
    logits = jnp.concatenate([positives, negatives], axis=1) / temperature
    logprobs = jax.nn.log_softmax(logits, axis=-1)
    return -jnp.sum(logprobs[:, 0]) / N


if __name__ == "__main__":
    key = jax.random.PRNGKey(0)
    temperature = 0.5

    # Case 1: tiny shapes consistent with the module ([B, D] projections).
    B, D = 2, 32
    k1, k2 = jax.random.split(key)
    zis = jax.random.normal(k1, (B, D), dtype=jnp.float32)
    zjs = jax.random.normal(k2, (B, D), dtype=jnp.float32)
    loss = jax.block_until_ready(ntxent_loss(zis, zjs, temperature))
    ref = jax.block_until_ready(_reference_loss(zis, zjs, temperature))
    assert jnp.allclose(loss, ref, rtol=1e-5, atol=1e-5), (loss, ref)

    # Case 2: forced tiny tiles to exercise the multi-block online-logsumexp
    # path, including both diagonal and off-diagonal tile branches (grid 4x4).
    B2, D2 = 16, 32
    k3, k4 = jax.random.split(k1)
    zis2 = jax.random.normal(k3, (B2, D2), dtype=jnp.float32)
    zjs2 = jax.random.normal(k4, (B2, D2), dtype=jnp.float32)
    loss2 = jax.block_until_ready(ntxent_loss(zis2, zjs2, temperature, tq=8, tk=8))
    ref2 = jax.block_until_ready(_reference_loss(zis2, zjs2, temperature))
    assert jnp.allclose(loss2, ref2, rtol=1e-5, atol=1e-5), (loss2, ref2)

    # Case 3: bf16 inputs exercise the bf16 MXU path (f32 softmax math).
    zis3 = zis2.astype(jnp.bfloat16)
    zjs3 = zjs2.astype(jnp.bfloat16)
    loss3 = jax.block_until_ready(ntxent_loss(zis3, zjs3, temperature))
    ref3 = jax.block_until_ready(_reference_loss(zis3, zjs3, temperature))
    assert jnp.allclose(loss3, ref3, rtol=5e-2, atol=5e-2), (loss3, ref3)

    print("KERNEL_OK")
</pallas_src>

<mosaic_0001>
module attributes {stable_mosaic.version = 11 : i64} {
  func.func @_ntxent_kernel(%arg0: i32, %arg1: i32, %arg2: memref<4x32xf32, #tpu.memory_space<vmem>>, %arg3: memref<4x32xf32, #tpu.memory_space<vmem>>, %arg4: memref<4x32xf32, #tpu.memory_space<vmem>>, %arg5: memref<4x1xf32, #tpu.memory_space<vmem>>, %arg6: memref<4x32xf32, #tpu.memory_space<vmem>>, %arg7: memref<4x1xf32, #tpu.memory_space<vmem>>, %arg8: memref<4x1xf32, #tpu.memory_space<vmem>>, %arg9: memref<4x1xf32, #tpu.memory_space<vmem>>) attributes {dimension_semantics = [#tpu.dimension_semantics<parallel>, #tpu.dimension_semantics<arbitrary>], iteration_bounds = array<i64: 1, 1>, scalar_prefetch = 0 : i64, scratch_operands = 4 : i64, tpu.core_type = #tpu.core_type<tc>, window_params = [{transform_indices = @transform_0, window_bounds = array<i64: 4, 32>}, {transform_indices = @transform_1, window_bounds = array<i64: 4, 32>}, {transform_indices = @transform_2, window_bounds = array<i64: 4, 32>}, {transform_indices = @transform_3, window_bounds = array<i64: 4, 1>}]} {
    %c0 = arith.constant 0 : index
    %c0_0 = arith.constant 0 : index
    %0 = vector.load %arg4[%c0, %c0_0] : memref<4x32xf32, #tpu.memory_space<vmem>>, vector<4x32xf32>
    %1 = arith.mulf %0, %0 : vector<4x32xf32>
    %cst = arith.constant dense<0.000000e+00> : vector<4xf32>
    %2 = vector.multi_reduction <add>, %1, %cst [1] : vector<4x32xf32> to vector<4xf32>
    %3 = vector.shape_cast %2 : vector<4xf32> to vector<4x1xf32>
    %cst_1 = arith.constant 1.000000e-16 : f32
    %4 = vector.broadcast %cst_1 : f32 to vector<4x1xf32>
    %5 = arith.maximumf %3, %4 : vector<4x1xf32>
    %6 = math.rsqrt %5 : vector<4x1xf32>
    %7 = vector.broadcast %6 : vector<4x1xf32> to vector<4x32xf32>
    %8 = arith.mulf %0, %7 : vector<4x32xf32>
    %c0_i32 = arith.constant 0 : i32
    %9 = arith.cmpi eq, %arg1, %c0_i32 : i32
    %10 = arith.extui %9 : i1 to i32
    %cst_2 = arith.constant 1.000000e-16 : f32
    %cst_3 = arith.constant -1.000000e+30 : f32
    %c0_i32_4 = arith.constant 0 : i32
    %11 = arith.cmpi ne, %10, %c0_i32_4 : i32
    scf.if %11 {
      %c0_16 = arith.constant 0 : index
      %c0_17 = arith.constant 0 : index
      %29 = vector.load %arg2[%c0_16, %c0_17] : memref<4x32xf32, #tpu.memory_space<vmem>>, vector<4x32xf32>
      %30 = arith.mulf %29, %29 : vector<4x32xf32>
      %cst_18 = arith.constant dense<0.000000e+00> : vector<4xf32>
      %31 = vector.multi_reduction <add>, %30, %cst_18 [1] : vector<4x32xf32> to vector<4xf32>
      %32 = vector.shape_cast %31 : vector<4xf32> to vector<4x1xf32>
      %33 = vector.broadcast %cst_2 : f32 to vector<4x1xf32>
      %34 = arith.maximumf %32, %33 : vector<4x1xf32>
      %35 = math.rsqrt %34 : vector<4x1xf32>
      %36 = vector.broadcast %35 : vector<4x1xf32> to vector<4x32xf32>
      %37 = arith.mulf %29, %36 : vector<4x32xf32>
      %cst_19 = arith.constant 2.000000e+00 : f32
      %38 = vector.broadcast %cst_19 : f32 to vector<4x32xf32>
      %39 = arith.mulf %37, %38 : vector<4x32xf32>
      %c0_20 = arith.constant 0 : index
      %c0_21 = arith.constant 0 : index
      %40 = vector.load %arg6[%c0_20, %c0_21] : memref<4x32xf32, #tpu.memory_space<vmem>>, vector<4x32xf32>
      tpu.vector_store %arg6[%c0_20, %c0_21], %39 {strides = array<i32>} : memref<4x32xf32, #tpu.memory_space<vmem>>, vector<4x32xf32>,
      %c0_22 = arith.constant 0 : index
      %c0_23 = arith.constant 0 : index
      %41 = vector.load %arg3[%c0_22, %c0_23] : memref<4x32xf32, #tpu.memory_space<vmem>>, vector<4x32xf32>
      %42 = arith.mulf %41, %41 : vector<4x32xf32>
      %cst_24 = arith.constant dense<0.000000e+00> : vector<4xf32>
      %43 = vector.multi_reduction <add>, %42, %cst_24 [1] : vector<4x32xf32> to vector<4xf32>
      %44 = vector.shape_cast %43 : vector<4xf32> to vector<4x1xf32>
      %45 = vector.broadcast %cst_2 : f32 to vector<4x1xf32>
      %46 = arith.maximumf %44, %45 : vector<4x1xf32>
      %47 = math.rsqrt %46 : vector<4x1xf32>
      %48 = vector.broadcast %47 : vector<4x1xf32> to vector<4x32xf32>
      %49 = arith.mulf %41, %48 : vector<4x32xf32>
      %50 = arith.mulf %39, %49 : vector<4x32xf32>
      %cst_25 = arith.constant dense<0.000000e+00> : vector<4xf32>
      %51 = vector.multi_reduction <add>, %50, %cst_25 [1] : vector<4x32xf32> to vector<4xf32>
      %52 = vector.shape_cast %51 : vector<4xf32> to vector<4x1xf32>
      %c0_26 = arith.constant 0 : index
      %c0_27 = arith.constant 0 : index
      %53 = vector.load %arg9[%c0_26, %c0_27] : memref<4x1xf32, #tpu.memory_space<vmem>>, vector<4x1xf32>
      tpu.vector_store %arg9[%c0_26, %c0_27], %52 {strides = array<i32>} : memref<4x1xf32, #tpu.memory_space<vmem>>, vector<4x1xf32>,
      %54 = vector.broadcast %cst_3 : f32 to vector<4x1xf32>
      %c0_28 = arith.constant 0 : index
      %c0_29 = arith.constant 0 : index
      %55 = vector.load %arg7[%c0_28, %c0_29] : memref<4x1xf32, #tpu.memory_space<vmem>>, vector<4x1xf32>
      tpu.vector_store %arg7[%c0_28, %c0_29], %54 {strides = array<i32>} : memref<4x1xf32, #tpu.memory_space<vmem>>, vector<4x1xf32>,
      %cst_30 = arith.constant 0.000000e+00 : f32
      %56 = vector.broadcast %cst_30 : f32 to vector<4x1xf32>
      %c0_31 = arith.constant 0 : index
      %c0_32 = arith.constant 0 : index
      %57 = vector.load %arg8[%c0_31, %c0_32] : memref<4x1xf32, #tpu.memory_space<vmem>>, vector<4x1xf32>
      tpu.vector_store %arg8[%c0_31, %c0_32], %56 {strides = array<i32>} : memref<4x1xf32, #tpu.memory_space<vmem>>, vector<4x1xf32>,
    } else {
    }
    %c0_5 = arith.constant 0 : index
    %c0_6 = arith.constant 0 : index
    %12 = vector.load %arg6[%c0_5, %c0_6] : memref<4x32xf32, #tpu.memory_space<vmem>>, vector<4x32xf32>
    %cst_7 = arith.constant dense<0.000000e+00> : vector<4x4xf32>
    %13 = tpu.matmul %12, %8, %cst_7 {dimension_numbers = #tpu.dot_dimension_numbers<[1], [1], [0], [0], [0, 0, 1, 0], [], []>} : vector<4x32xf32>, vector<4x32xf32>, vector<4x4xf32> -> vector<4x4xf32>
    %c4_i32 = arith.constant 4 : i32
    %14 = arith.muli %arg0, %c4_i32 : i32
    %c4_i32_8 = arith.constant 4 : i32
    %15 = arith.muli %arg1, %c4_i32_8 : i32
    %c4_i32_9 = arith.constant 4 : i32
    %16 = arith.addi %15, %c4_i32_9 : i32
    %17 = arith.cmpi slt, %14, %16 : i32
    %c4_i32_10 = arith.constant 4 : i32
    %18 = arith.addi %14, %c4_i32_10 : i32
    %19 = arith.cmpi slt, %15, %18 : i32
    %20 = arith.andi %17, %19 : i1
    %21 = arith.extui %20 : i1 to i32
    %cst_11 = arith.constant -1.000000e+30 : f32
    %c0_i32_12 = arith.constant 0 : i32
    %22 = arith.cmpi ne, %21, %c0_i32_12 : i32
    scf.if %22 {
      %29 = tpu.iota {dimensions = array<i32: 0>} : vector<4x4xi32>
      %30 = vector.broadcast %14 : i32 to vector<4x4xi32>
      %31 = arith.addi %30, %29 : vector<4x4xi32>
      %32 = tpu.iota {dimensions = array<i32: 1>} : vector<4x4xi32>
      %33 = vector.broadcast %15 : i32 to vector<4x4xi32>
      %34 = arith.addi %33, %32 : vector<4x4xi32>
      %35 = arith.cmpi eq, %31, %34 : vector<4x4xi32>
      %36 = vector.broadcast %cst_11 : f32 to vector<4x4xf32>
      %37 = arith.select %35, %36, %13 : vector<4x4xi1>, vector<4x4xf32>
      %c0_16 = arith.constant 0 : index
      %c0_17 = arith.constant 0 : index
      %38 = vector.load %arg7[%c0_16, %c0_17] : memref<4x1xf32, #tpu.memory_space<vmem>>, vector<4x1xf32>
      %cst_18 = arith.constant dense<0xFF800000> : vector<4xf32>
      %39 = vector.multi_reduction <maximumf>, %37, %cst_18 [1] : vector<4x4xf32> to vector<4xf32>
      %40 = vector.shape_cast %39 : vector<4xf32> to vector<4x1xf32>
      %41 = arith.maximumf %38, %40 : vector<4x1xf32>
      %42 = arith.subf %38, %41 : vector<4x1xf32>
      %43 = math.exp %42 : vector<4x1xf32>
      %c0_19 = arith.constant 0 : index
      %c0_20 = arith.constant 0 : index
      %44 = vector.load %arg8[%c0_19, %c0_20] : memref<4x1xf32, #tpu.memory_space<vmem>>, vector<4x1xf32>
      %45 = arith.mulf %43, %44 : vector<4x1xf32>
      %46 = vector.broadcast %41 : vector<4x1xf32> to vector<4x4xf32>
      %47 = arith.subf %37, %46 : vector<4x4xf32>
      %48 = math.exp %47 : vector<4x4xf32>
      %cst_21 = arith.constant dense<0.000000e+00> : vector<4xf32>
      %49 = vector.multi_reduction <add>, %48, %cst_21 [1] : vector<4x4xf32> to vector<4xf32>
      %50 = vector.shape_cast %49 : vector<4xf32> to vector<4x1xf32>
      %51 = arith.addf %45, %50 : vector<4x1xf32>
      %c0_22 = arith.constant 0 : index
      %c0_23 = arith.constant 0 : index
      %52 = vector.load %arg8[%c0_22, %c0_23] : memref<4x1xf32, #tpu.memory_space<vmem>>, vector<4x1xf32>
      tpu.vector_store %arg8[%c0_22, %c0_23], %51 {strides = array<i32>} : memref<4x1xf32, #tpu.memory_space<vmem>>, vector<4x1xf32>,
      %c0_24 = arith.constant 0 : index
      %c0_25 = arith.constant 0 : index
      %53 = vector.load %arg7[%c0_24, %c0_25] : memref<4x1xf32, #tpu.memory_space<vmem>>, vector<4x1xf32>
      tpu.vector_store %arg7[%c0_24, %c0_25], %41 {strides = array<i32>} : memref<4x1xf32, #tpu.memory_space<vmem>>, vector<4x1xf32>,
    } else {
    }
    %true = arith.constant true
    %23 = arith.xori %20, %true : i1
    %24 = arith.extui %23 : i1 to i32
    %c0_i32_13 = arith.constant 0 : i32
    %25 = arith.cmpi ne, %24, %c0_i32_13 : i32
    scf.if %25 {
      %c0_16 = arith.constant 0 : index
      %c0_17 = arith.constant 0 : index
      %29 = vector.load %arg7[%c0_16, %c0_17] : memref<4x1xf32, #tpu.memory_space<vmem>>, vector<4x1xf32>
      %cst_18 = arith.constant dense<0xFF800000> : vector<4xf32>
      %30 = vector.multi_reduction <maximumf>, %13, %cst_18 [1] : vector<4x4xf32> to vector<4xf32>
      %31 = vector.shape_cast %30 : vector<4xf32> to vector<4x1xf32>
      %32 = arith.maximumf %29, %31 : vector<4x1xf32>
      %33 = arith.subf %29, %32 : vector<4x1xf32>
      %34 = math.exp %33 : vector<4x1xf32>
      %c0_19 = arith.constant 0 : index
      %c0_20 = arith.constant 0 : index
      %35 = vector.load %arg8[%c0_19, %c0_20] : memref<4x1xf32, #tpu.memory_space<vmem>>, vector<4x1xf32>
      %36 = arith.mulf %34, %35 : vector<4x1xf32>
      %37 = vector.broadcast %32 : vector<4x1xf32> to vector<4x4xf32>
      %38 = arith.subf %13, %37 : vector<4x4xf32>
      %39 = math.exp %38 : vector<4x4xf32>
      %cst_21 = arith.constant dense<0.000000e+00> : vector<4xf32>
      %40 = vector.multi_reduction <add>, %39, %cst_21 [1] : vector<4x4xf32> to vector<4xf32>
      %41 = vector.shape_cast %40 : vector<4xf32> to vector<4x1xf32>
      %42 = arith.addf %36, %41 : vector<4x1xf32>
      %c0_22 = arith.constant 0 : index
      %c0_23 = arith.constant 0 : index
      %43 = vector.load %arg8[%c0_22, %c0_23] : memref<4x1xf32, #tpu.memory_space<vmem>>, vector<4x1xf32>
      tpu.vector_store %arg8[%c0_22, %c0_23], %42 {strides = array<i32>} : memref<4x1xf32, #tpu.memory_space<vmem>>, vector<4x1xf32>,
      %c0_24 = arith.constant 0 : index
      %c0_25 = arith.constant 0 : index
      %44 = vector.load %arg7[%c0_24, %c0_25] : memref<4x1xf32, #tpu.memory_space<vmem>>, vector<4x1xf32>
      tpu.vector_store %arg7[%c0_24, %c0_25], %32 {strides = array<i32>} : memref<4x1xf32, #tpu.memory_space<vmem>>, vector<4x1xf32>,
    } else {
    }
    %c0_i32_14 = arith.constant 0 : i32
    %26 = arith.cmpi eq, %arg1, %c0_i32_14 : i32
    %27 = arith.extui %26 : i1 to i32
    %c0_i32_15 = arith.constant 0 : i32
    %28 = arith.cmpi ne, %27, %c0_i32_15 : i32
    scf.if %28 {
      %c0_16 = arith.constant 0 : index
      %c0_17 = arith.constant 0 : index
      %29 = vector.load %arg7[%c0_16, %c0_17] : memref<4x1xf32, #tpu.memory_space<vmem>>, vector<4x1xf32>
      %c0_18 = arith.constant 0 : index
      %c0_19 = arith.constant 0 : index
      %30 = vector.load %arg8[%c0_18, %c0_19] : memref<4x1xf32, #tpu.memory_space<vmem>>, vector<4x1xf32>
      %31 = math.log %30 : vector<4x1xf32>
      %32 = arith.addf %29, %31 : vector<4x1xf32>
      %c0_20 = arith.constant 0 : index
      %c0_21 = arith.constant 0 : index
      %33 = vector.load %arg9[%c0_20, %c0_21] : memref<4x1xf32, #tpu.memory_space<vmem>>, vector<4x1xf32>
      %34 = arith.subf %32, %33 : vector<4x1xf32>
      %c0_22 = arith.constant 0 : index
      %c0_23 = arith.constant 0 : index
      %35 = vector.load %arg5[%c0_22, %c0_23] : memref<4x1xf32, #tpu.memory_space<vmem>>, vector<4x1xf32>
      tpu.vector_store %arg5[%c0_22, %c0_23], %34 {strides = array<i32>} : memref<4x1xf32, #tpu.memory_space<vmem>>, vector<4x1xf32>,
    } else {
    }
    return
  }
  func.func @transform_0(%arg0: i32, %arg1: i32) -> (i32, i32) {
    %c0_i32 = arith.constant 0 : i32
    %c0_i32_0 = arith.constant 0 : i32
    return %arg0, %c0_i32 : i32, i32
  }
  func.func @transform_1(%arg0: i32, %arg1: i32) -> (i32, i32) {
    %c0_i32 = arith.constant 0 : i32
    %c0_i32_0 = arith.constant 0 : i32
    return %arg0, %c0_i32 : i32, i32
  }
  func.func @transform_2(%arg0: i32, %arg1: i32) -> (i32, i32) {
    %c0_i32 = arith.constant 0 : i32
    %c0_i32_0 = arith.constant 0 : i32
    return %arg1, %c0_i32 : i32, i32
  }
  func.func @transform_3(%arg0: i32, %arg1: i32) -> (i32, i32) {
    %c0_i32 = arith.constant 0 : i32
    %c0_i32_0 = arith.constant 0 : i32
    return %arg0, %c0_i32 : i32, i32
  }
}

</mosaic_0001>

<bundles_post_ra>
// kernel: tpu_custom_call.1
= control target key start
LH: loop header
LB: loop body
LE: loop exit
PB: predicated region body
PF: predicated region fallthrough
CT: control target
= control target key end

     0   :  { %8 = vsyncpa [#allocation7], 0  ;;  %s394_s0 = inlined_call_operand.hbm [shape: f32[4,32], index: 0, kind: input, shape index: {}]   ;;  %s395_s1 = inlined_call_operand.hbm [shape: f32[4,32], index: 1, kind: input, shape index: {}]   ;;  %s396_s2 = inlined_call_operand.vmem [shape: f32[4,32], index: 2, kind: input, shape index: {}]   ;;  %s397_s3 = inlined_call_operand.vmem [shape: f32[4,1], index: 3, kind: output, shape index: {}]  }
   0x1   :  { %9 = vsyncpa [#allocation9], 0  ;;  %s325_s12 = smov [#allocation6]   ;;  %s326_s14 = smov [#allocation8]  }
   0x2   :  { %s16_s13 = sshll.u32 %s325_s12, 4  ;;  %s26_s15 = sshll.u32 %s326_s14, 4  ;;  %s17_s13 = int_to_ptr.vmem [resolvable:$true] %s16_s13  ;;  %s27_s15 = int_to_ptr.vmem [resolvable:$true] %s26_s15 }
   0x3   :  { %s277_s18 = scalar_lea.hbm %s394_s0, 64 }
   0x4   :  { %p278_p0 = scmp.ne.s32.totalorder %s394_s0, %s277_s18  ;;  %p281_p1 = scmp.lt.u32.totalorder %s277_s18, %s394_s0 }
   0x6   :  { %p283_p2 = pnand %p281_p1, %p278_p0 }
   0x8   :  { %286 = shalt.err (!%p283_p2)
}
   0x9   :  { %s287_s23 = scalar_lea.vmem %s17_s13, 64  ;;  %p292_p4 = scmp.lt.s32.totalorder %s17_s13, %s17_s13 }
   0xa   :  { %p288_p3 = scmp.ne.s32.totalorder %s17_s13, %s287_s23  ;;  %p293_p5 = scmp.lt.s32.totalorder %s287_s23, %s287_s23 }
   0xc   :  { %p294_p6 = por %p293_p5, %p292_p4 }
   0xe   :  { %p295_p7 = pnand %p294_p6, %p288_p3 }
  0x10   :  { %298 = shalt.err (!%p295_p7)
}
  0x11   :  { %19 = dma.hbm_to_vmem [thread:$0]  %s394_s0, 64, %s17_s13, [#allocation7]  }
  0x12   :  { %s299_s28 = scalar_lea.hbm %s395_s1, 64 }
  0x13   :  { %p300_p8 = scmp.ne.s32.totalorder %s395_s1, %s299_s28  ;;  %p303_p9 = scmp.lt.u32.totalorder %s299_s28, %s395_s1 }
  0x15   :  { %p305_p10 = pnand %p303_p9, %p300_p8 }
  0x17   :  { %308 = shalt.err (!%p305_p10)
}
  0x18   :  { %s309_s6 = scalar_lea.vmem %s27_s15, 64  ;;  %p314_p12 = scmp.lt.s32.totalorder %s27_s15, %s27_s15 }
  0x19   :  { %p310_p11 = scmp.ne.s32.totalorder %s27_s15, %s309_s6  ;;  %p315_p13 = scmp.lt.s32.totalorder %s309_s6, %s309_s6 }
  0x1b   :  { %p316_p0 = por %p315_p13, %p314_p12 }
  0x1d   :  { %p317_p1 = pnand %p316_p0, %p310_p11 }
  0x1f   :  { %320 = shalt.err (!%p317_p1)
}
  0x20   :  { %29 = dma.hbm_to_vmem [thread:$0]  %s395_s1, 64, %s27_s15, [#allocation9]  }
  0x21   :  { %321 = dma.done.wait [#allocation7], 64  }
  0x22   :  { %322 = vsyncadd [#allocation7], 4294967232 }
  0x23   :  { %323 = dma.done.wait [#allocation9], 64  }
  0x24   :  { %324 = vsyncadd [#allocation9], 4294967232  ;;  %vm40_vm0 = vcmask 257024   ;;  %v51_v0 = vld [vmem:[#allocation6] sm:$0xf]  ;;  %vm73_vm1 = vcmask 3072   ;;  %v165_v21 = vlaneseq }
  0x25   :  { %v38_v1 = vld [vmem:[%s396_s2] sm:$0xf]  ;;  %v52_v2 = vmul.f32 %v51_v0, %v51_v0  ;;  %v61_v4 = vld [vmem:[#allocation8] sm:$0xf]  ;;  %v327_v9 = vmov 0.0   ;;  %vm328_vm2 = vmmov 0  }
  0x26   :  { %v39_v3 = vmul.f32 %v38_v1, %v38_v1  ;;  %v62_v7 = vmul.f32 %v61_v4, %v61_v4  ;;  %76 = vst.msk [vmem:[#allocation4] sm:$0xf] %vm73_vm1, %v327_v9  ;;  %252 = vmatprep.subr.mxu0 %v327_v9  ;;  %254 = vmatprep.mubr.msk.f32.mxu0 %vm328_vm2, %v327_v9  ;;  %vm78_vm3 = vcmask 261120   ;;  %v329_v20 = vmov -1e+30  }
  0x27   :  { %v53_v5 = vsel %vm40_vm0, %v52_v2, 0.0  ;;  %75 = vst.msk [vmem:[#allocation3] sm:$0xf] %vm73_vm1, %v329_v20  ;;  %v166_v22 = vshrl.u32 %v165_v21, 7  ;;  %v170_v23 = vand.u32 127, %v165_v21  ;;  %vm176_vm5 = vcmask 27648  }
  0x28   :  { %54 = vadd.xlane.f32.xlu0 %v53_v5  ;;  %v41_v6 = vsel %vm40_vm0, %v39_v3, 0.0  ;;  %v63_v8 = vsel %vm40_vm0, %v62_v7, 0.0  ;;  %v330_v28 = vmov 0  }
  0x29   :  { %vm173_vm4 = vcmp.eq.s32.totalorder %v166_v22, %v170_v23  ;;  %263 = vset.pattern.permute.xlu1 %v330_v28  ;;  %264 = vset.pattern.permute.xlu0 %v330_v28 }
  0x2c   :  { %42 = vadd.xlane.f32.xlu0 %v41_v6 }
  0x2d   :  { %v184_v46 = vld [vmem:[#allocation4] sm:$0xf] }
  0x2e   :  { %v175_v29 = vld [vmem:[#allocation3] sm:$0xf] }
  0x30   :  { %64 = vadd.xlane.f32.xlu0 %v63_v8 }
  0xb5   :  { %v55_v10 = vpop.xlane.xlu0 %54 }
  0xb6   :  { %v56_v11 = vmax.f32 %v55_v10, 1e-16 }
  0xb8   :  { %265 = vrsqrt.f32 %v56_v11 }
  0xb9   :  { %v43_v12 = vpop.xlane.xlu0 %42 }
  0xba   :  { %v44_v13 = vmax.f32 %v43_v12, 1e-16 }
  0xbc   :  { %267 = vrsqrt.f32 %v44_v13 }
  0xbd   :  { %v65_v33 = vpop.xlane.xlu0 %64 }
  0xbe   :  { %v66_v34 = vmax.f32 %v65_v33, 1e-16 }
  0xc0   :  { %269 = vrsqrt.f32 %v66_v34 }
  0xc2   :  { %v266_v14 = vpop.eup %265 }
  0xc3   :  { %v58_v15 = vmul.f32 %v266_v14, %v51_v0 }
  0xc5   :  { %v59_v16 = vmul.f32 2.0, %v58_v15 }
  0xc6   :  { %v268_v17 = vpop.eup %267 }
  0xc7   :  { %60 = vst.msk [vmem:[#allocation2] sm:$0xf] %vm40_vm0, %v59_v16  ;;  %v46_v18 = vmul.f32 %v268_v17, %v38_v1 }
  0xc9   :  { %253 = vmatpush3.xpose.msk.msra.mxu0 %vm78_vm3, %v46_v18 }
  0xca   :  { %v270_v38 = vpop.eup %269 }
  0xcb   :  { %v68_v39 = vmul.f32 %v270_v38, %v61_v4 }
  0xcd   :  { %v69_v42 = vmul.f32 %v68_v39, %v59_v16 }
  0xce   :  { %v77_v19 = vld [vmem:[#allocation2] sm:$0xf] }
  0xcf   :  { %255 = vmatmul.mubr.msk.f32.vlgmr.msra.gmra.mrb[0].mxu0 %vm78_vm3, %v77_v19  ;;  %v70_v43 = vsel %vm40_vm0, %v69_v42, 0.0 }
 0x1a2   :  { %v151_v24 = vpop.f32.mrb[0].mxu0 }
 0x1a3   :  { %v174_v25 = vsel %vm173_vm4, -1e+30, %v151_v24  ;;  %v256_v26 = vpop.f32.mrb[1].mxu0 }
 0x1a4   :  { %v177_v27 = vsel %vm176_vm5, %v174_v25, -inf }
 0x1a5   :  { %178 = vmax.xlane.f32.xlu1 %v177_v27 }
 0x232   :  { %v179_v30 = vpop.xlane.xlu1 %178 }
 0x233   :  { %v180_v31 = vmax.f32 %v175_v29, %v179_v30 }
 0x235   :  { %v181_v32 = vsub.f32 %v175_v29, %v180_v31  ;;  %200 = vst.msk [vmem:[#allocation3] sm:$0xf] %vm73_vm1, %v180_v31  ;;  %188 = vperm.xlu1 %263, %v180_v31  }
 0x237   :  { %v182_v44 = vmul.f32 1.442695, %v181_v32 }
 0x23c   :  { %v233_v54 = vld [vmem:[#allocation3] sm:$0xf] }
 0x2b4   :  { %v189_v35 = vpop.permute.xlu1 %188 }
 0x2b5   :  { %v191_v36 = vsub.f32 %v174_v25, %v189_v35 }
 0x2b7   :  { %v192_v37 = vmul.f32 1.442695, %v191_v36 }
 0x2b9   :  { %271 = vpow2.f32 %v192_v37 }
 0x2ba   :  { %273 = vpow2.f32 %v182_v44 }
 0x2c3   :  { %v272_v40 = vpop.eup %271 }
 0x2c4   :  { %v194_v41 = vsel %vm176_vm5, %v272_v40, 0.0  ;;  %v274_v45 = vpop.eup %273 }
 0x2c5   :  { %195 = vadd.xlane.f32.xlu0 %v194_v41  ;;  %v185_v47 = vmul.f32 %v274_v45, %v184_v46 }
 0x2c9   :  { %71 = vadd.xlane.f32.xlu0 %v70_v43 }
 0x352   :  { %v196_v48 = vpop.xlane.xlu0 %195 }
 0x353   :  { %v197_v49 = vadd.f32 %v196_v48, %v185_v47 }
 0x355   :  { %199 = vst.msk [vmem:[#allocation4] sm:$0xf] %vm73_vm1, %v197_v49 }
 0x356   :  { %v72_v50 = vpop.xlane.xlu0 %71 }
 0x357   :  { %74 = vst.msk [vmem:[#allocation5] sm:$0xf] %vm73_vm1, %v72_v50 }
 0x35c   :  { %v234_v51 = vld [vmem:[#allocation4] sm:$0xf] }
 0x35d   :  { %275 = vlog2.f32 %v234_v51 }
 0x35e   :  { %v238_v56 = vld [vmem:[#allocation5] sm:$0xf] }
 0x367   :  { %v276_v52 = vpop.eup %275 }
 0x368   :  { %v236_v53 = vmul.f32 0.6931472, %v276_v52 }
 0x36a   :  { %v237_v55 = vadd.f32 %v236_v53, %v233_v54 }
 0x36c   :  { %v239_v57 = vsub.f32 %v237_v55, %v238_v56 }
 0x36e   :  { %241 = vst.msk [vmem:[%s397_s3] sm:$0xf] %vm73_vm1, %v239_v57 }
 0x36f   :  { %246 = vsyncpa [#allocation7], 1 }
 0x370   :  { %247 = vsyncpa [#allocation9], 1 }

</bundles_post_ra>
